<compile_context>
chip_gen: v6e
topology: v6e:2x2x1
jax: 0.10.0
libtpu: 0.0.40
codegen_flags: <defaults>
</compile_context>

<pallas_src>
import math
import functools

import jax
import jax.numpy as jnp
from jax import lax
from jax.experimental import pallas as pl
from jax.experimental.pallas import tpu as pltpu


def _mhsa_kernel(h_ref, wqvk_ref, wo_ref, o_ref, *,
                 block_batch, seq_len, num_heads, dim,
                 packed_io, approx_softmax):
    """One grid step == `block_batch` batch elements (rows = block_batch*seq_len)."""
    Bb, S, D, H = block_batch, seq_len, dim, num_heads
    dh = D // H
    R = Bb * S

    # ---- lane-dense load: unpack (R*D/128, 128) -> logical (R, D) ----------
    hf = h_ref[...]
    if packed_io:
        hf = hf.reshape(R, D)

    # ---- fused QVK projection: one (R, D) x (D, 3D) MXU matmul -------------
    qvk = jnp.dot(hf, wqvk_ref[...],
                  preferred_element_type=jnp.float32)            # (R, 3D)

    # torch unbind(dim=2) on (..., 3, H, dh) yields q, v, k IN THAT ORDER.
    q = qvk[:, 0 * D:1 * D]                                      # (R, D)
    v = qvk[:, 1 * D:2 * D]
    k = qvk[:, 2 * D:3 * D]
    # NOTE: the optional 1/sqrt(dim) score scale is folded into the q columns
    # of Wqvk on the host (mask entries are 0 / -inf, so exactly equivalent).

    # Strict-upper-triangular causal mask (== torch .triu(1)), built in-kernel
    # ONCE at the full (Bb, S, S) shape and reused by every head (the broadcast
    # is hoisted out of the loop; JAX does not CSE broadcast_in_dim).
    row = lax.broadcasted_iota(jnp.int32, (Bb, S, S), 1)
    col = lax.broadcasted_iota(jnp.int32, (Bb, S, S), 2)
    mask3 = jnp.where(row < col, jnp.float32(-jnp.inf), jnp.float32(0.0))

    wo = wo_ref[...]                                             # (D, D)
    out = jnp.zeros((R, D), jnp.float32)

    # TODO(synk): heads stay a short static loop (Mosaic dot_general supports a
    # single *leading* batch dim); packing heads/batch-quads into the 128-lane
    # dim with a segment-wise (pltpu.roll tree) softmax would cut the remaining
    # VPU/EUP lane waste of the (Bb,S,S) intermediates further.
    for hd in range(H):
        sl = slice(hd * dh, (hd + 1) * dh)
        qh = q[:, sl].reshape(Bb, S, dh)                         # (Bb, S, dh)
        kh = k[:, sl].reshape(Bb, S, dh)
        vh = v[:, sl].reshape(Bb, S, dh)

        # NT contraction over dh (no materialized transpose), batched over Bb.
        s = jnp.einsum('bsd,btd->bst', qh, kh,
                       preferred_element_type=jnp.float32)       # (Bb, S, S)
        s = s + mask3

        # Softmax over t (last axis); -inf entries become exact zeros.
        m = jnp.max(s, axis=2, keepdims=True)
        e = jnp.exp(s - m)
        l = jnp.sum(e, axis=2, keepdims=True)
        if approx_softmax:
            w = e * pl.reciprocal(l, approx=True)                # EUP slot
        else:
            w = e / l

        wv = jnp.einsum('bst,btd->bsd', w, vh,
                        preferred_element_type=jnp.float32)      # (Bb, S, dh)

        # Per-head accumulation of the output projection: removes the H-way
        # concatenate on an 8-lane minor dim and keeps Wo on the MXU.
        out = out + jnp.dot(wv.reshape(R, dh), wo[sl, :],
                            preferred_element_type=jnp.float32)  # (R, D)

    if packed_io:
        out = out.reshape(R * D // 128, 128)   # lane-dense repack before store
    o_ref[...] = out.astype(o_ref.dtype)


def _choose_block_batch(batch, seq_len, dim, *, target_rows=1024, max_rows=8192):
    """Pick batch elements per grid step.

    Priorities:
      * grid length >= 2 whenever the batch allows it (v7x dual-TC sharding,
        DMA/compute overlap),
      * rows*dim a multiple of 1024 so the I/O slab can be lane-dense
        ((rows*dim/128, 128) blocks satisfying the (8,128) rule),
      * rows near target_rows so the MXU M dimension is filled and the
        ~0.35us/step grid overhead is amortized.
    The batch is padded up to a multiple of the chosen block by the wrapper,
    so divisibility of `batch` is never a constraint.
    """
    sub_bb = 8 // math.gcd(8, seq_len)                   # rows % 8 == 0
    pack_bb = 1024 // math.gcd(1024, seq_len * dim)      # rows*dim % 1024 == 0

    bb = max(1, min(max_rows, target_rows) // seq_len)
    bb = min(bb, batch)                                  # never exceed real batch
    if batch >= 2:
        bb = min(bb, max(1, batch // 2))                 # keep grid >= 2
    if bb >= pack_bb:
        bb = (bb // pack_bb) * pack_bb                   # lane-dense I/O capable
    else:
        bb = -(-bb // sub_bb) * sub_bb                   # at least sublane aligned
    return max(1, bb)


def multi_head_self_attention(h, wqvk_t, wo_t, *, num_heads,
                              scale_attention_scores=False,
                              approx_softmax=True,
                              block_batch=None,
                              vmem_limit_bytes=None):
    """h: (B, S, D);  wqvk_t: (D, 3D);  wo_t: (D, D).  Returns (B, S, D).

    With the default target_rows (~1024 rows/step) the per-step VMEM footprint
    (lane-padded (Bb,S,S) score intermediates + I/O double buffers) is a few
    MiB and fits the default scoped VMEM limit on v5e/v6e/v7x.  Pass
    vmem_limit_bytes when raising block_batch aggressively.
    """
    B, S, D = h.shape
    H = num_heads
    assert D % H == 0
    assert wqvk_t.shape == (D, 3 * D)
    assert wo_t.shape == (D, D)

    if block_batch is None:
        block_batch = _choose_block_batch(B, S, D)
    rows = block_batch * S

    # Lane-dense packed I/O when the block is big enough; otherwise fall back
    # to the plain (rows, D) layout (still must satisfy the (8,128) rule).
    packed_io = (rows * D) % (8 * 128) == 0
    if not packed_io:
        assert rows % 8 == 0 or block_batch >= B, (
            "block_batch*seq_len must be a multiple of 8 (or cover the whole "
            "batch) for an unpacked (rows, dim) block")

    # Pad the batch so awkward batch sizes don't force tiny blocks/huge grids.
    B_pad = -(-B // block_batch) * block_batch
    h_p = h if B_pad == B else jnp.pad(h, ((0, B_pad - B), (0, 0), (0, 0)))
    grid = (B_pad // block_batch,)

    # Fold the optional 1/sqrt(dim) score scaling into the q columns of Wqvk
    # (static weights; exactly equivalent since mask entries are 0 / -inf).
    if scale_attention_scores:
        wqvk_t = wqvk_t.at[:, :D].multiply(1.0 / math.sqrt(D))

    if packed_io:
        slab_shape = (B_pad * S * D // 128, 128)
        blk = (rows * D // 128, 128)
    else:
        slab_shape = (B_pad * S, D)
        blk = (rows, D)
    h2 = h_p.reshape(slab_shape)     # free row-major reinterpretation in HBM

    kernel = functools.partial(
        _mhsa_kernel, block_batch=block_batch, seq_len=S, num_heads=H,
        dim=D, packed_io=packed_io, approx_softmax=approx_softmax)

    # Advisory cost estimate so XLA schedules around the custom call sensibly.
    dh = D // H
    flops = int(2 * B_pad * S * D * 3 * D          # QVK projection
                + 4 * B_pad * H * S * S * dh       # scores + weighted V
                + 2 * B_pad * S * D * D)           # output projection
    cost = pl.CostEstimate(
        flops=flops,
        transcendentals=int(B_pad * H * S * S),
        bytes_accessed=int(4 * (2 * B_pad * S * D + 3 * D * D + D * D)))

    out2 = pl.pallas_call(
        kernel,
        out_shape=jax.ShapeDtypeStruct(slab_shape, h.dtype),
        grid_spec=pltpu.PrefetchScalarGridSpec(
            num_scalar_prefetch=0,
            grid=grid,
            in_specs=[
                pl.BlockSpec(blk, lambda i: (i, 0)),            # activations
                pl.BlockSpec((D, 3 * D), lambda i: (0, 0)),     # Wqvk^T (shared)
                pl.BlockSpec((D, D), lambda i: (0, 0)),         # Wo^T   (shared)
            ],
            out_specs=pl.BlockSpec(blk, lambda i: (i, 0)),
        ),
        compiler_params=pltpu.CompilerParams(
            dimension_semantics=("parallel",),
            vmem_limit_bytes=vmem_limit_bytes),
        cost_estimate=cost,
    )(h2, wqvk_t, wo_t)

    out = out2.reshape(B_pad, S, D)
    return out[:B] if B_pad != B else out


def _reference(h, wqvk_t, wo_t, num_heads, scale_attention_scores=False):
    """Pure-JAX reference mirroring the PyTorch forward (mem=None)."""
    B, S, D = h.shape
    dh = D // num_heads
    qvk = (h @ wqvk_t).reshape(B, S, 3, num_heads, dh)
    q, v, k = qvk[:, :, 0], qvk[:, :, 1], qvk[:, :, 2]
    scores = jnp.einsum('bshi,bthi->bsth', q, k)
    mask = jnp.where(jnp.arange(S)[:, None] < jnp.arange(S)[None, :],
                     jnp.float32(-jnp.inf), jnp.float32(0.0))
    scores = scores + mask[None, :, :, None]
    if scale_attention_scores:
        scores = scores / math.sqrt(D)
    w = jax.nn.softmax(scores, axis=2)
    wv = jnp.einsum('bsth,bthi->bshi', w, v).reshape(B, S, D)
    return wv @ wo_t


# TODO(synk): the mem-based incremental-decode path (mem is not None) keeps a
# growing python-side KV list; it is not expressed as a Pallas kernel here.

if __name__ == "__main__":
    # Small shapes consistent with the module:
    #   batch=2, num_internal_sites=8 (num_sites=7), num_heads=4, dim=32.
    B, S, H, D = 2, 8, 4, 32

    key = jax.random.PRNGKey(0)
    k_h, k_qvk, k_o, k_h8, k_h5 = jax.random.split(key, 5)

    # Deterministic parameter init (PyTorch Linear default: U(-1/sqrt(in), 1/sqrt(in))).
    bound = 1.0 / math.sqrt(D)
    w_qvk = jax.random.uniform(k_qvk, (3 * D, D), jnp.float32, -bound, bound)  # torch (out,in)
    w_o = jax.random.uniform(k_o, (D, D), jnp.float32, -bound, bound)          # torch (out,in)
    wqvk_t = w_qvk.T        # (D, 3D)  so  y = x @ wqvk_t
    wo_t = w_o.T            # (D, D)

    def check(h_in, scale, approx, atol, rtol):
        ref = _reference(h_in, wqvk_t, wo_t, H, scale_attention_scores=scale)
        out = jax.block_until_ready(multi_head_self_attention(
            h_in, wqvk_t, wo_t, num_heads=H, scale_attention_scores=scale,
            approx_softmax=approx))
        assert out.shape == h_in.shape
        assert jnp.allclose(out, ref, atol=atol, rtol=rtol), \
            f"mismatch (B={h_in.shape[0]}, scale={scale}, approx={approx})"

    # Default module shape: grid=(2,) (block_batch=1), unpacked fallback layout.
    h = jax.random.normal(k_h, (B, S, D), dtype=jnp.float32)
    check(h, scale=False, approx=False, atol=1e-5, rtol=1e-5)   # exact softmax
    check(h, scale=True,  approx=False, atol=1e-5, rtol=1e-5)   # scale folded into Wqvk
    check(h, scale=False, approx=True,  atol=2e-2, rtol=2e-2)   # EUP approx reciprocal

    # Lane-dense packed I/O path with grid=(2,) (block_batch=4).
    h8 = jax.random.normal(k_h8, (8, S, D), dtype=jnp.float32)
    check(h8, scale=False, approx=False, atol=1e-5, rtol=1e-5)

    # Awkward batch size -> batch-padding path (B=5 padded to 6, grid=(3,)).
    h5 = jax.random.normal(k_h5, (5, S, D), dtype=jnp.float32)
    check(h5, scale=True, approx=False, atol=1e-5, rtol=1e-5)

    print("KERNEL_OK")
</pallas_src>

<mosaic_0001>
module attributes {stable_mosaic.version = 11 : i64} {
  func.func @_mhsa_kernel(%arg0: i32, %arg1: memref<8x32xf32, #tpu.memory_space<vmem>>, %arg2: memref<32x96xf32, #tpu.memory_space<vmem>>, %arg3: memref<32x32xf32, #tpu.memory_space<vmem>>, %arg4: memref<8x32xf32, #tpu.memory_space<vmem>>) attributes {dimension_semantics = [#tpu.dimension_semantics<parallel>], iteration_bounds = array<i64: 2>, scalar_prefetch = 0 : i64, scratch_operands = 0 : i64, tpu.core_type = #tpu.core_type<tc>, window_params = [{transform_indices = @transform_0, window_bounds = array<i64: 8, 32>}, {pipeline_mode = #tpu.pipeline_mode<synchronous>, transform_indices = @transform_1, window_bounds = array<i64: 32, 96>}, {pipeline_mode = #tpu.pipeline_mode<synchronous>, transform_indices = @transform_2, window_bounds = array<i64: 32, 32>}, {transform_indices = @transform_3, window_bounds = array<i64: 8, 32>}]} {
    %c0 = arith.constant 0 : index
    %c0_0 = arith.constant 0 : index
    %0 = vector.load %arg1[%c0, %c0_0] : memref<8x32xf32, #tpu.memory_space<vmem>>, vector<8x32xf32>
    %c0_1 = arith.constant 0 : index
    %c0_2 = arith.constant 0 : index
    %1 = vector.load %arg2[%c0_1, %c0_2] : memref<32x96xf32, #tpu.memory_space<vmem>>, vector<32x96xf32>
    %cst = arith.constant dense<0.000000e+00> : vector<8x96xf32>
    %2 = tpu.matmul %0, %1, %cst {dimension_numbers = #tpu.dot_dimension_numbers<[1], [0], [0], [1], [0, 0, 1, 1], [], []>} : vector<8x32xf32>, vector<32x96xf32>, vector<8x96xf32> -> vector<8x96xf32>
    %3 = vector.extract_strided_slice %2 {offsets = [0, 0], sizes = [8, 32], strides = [1, 1]} : vector<8x96xf32> to vector<8x32xf32>
    %4 = vector.extract_strided_slice %2 {offsets = [0, 32], sizes = [8, 32], strides = [1, 1]} : vector<8x96xf32> to vector<8x32xf32>
    %5 = vector.extract_strided_slice %2 {offsets = [0, 64], sizes = [8, 32], strides = [1, 1]} : vector<8x96xf32> to vector<8x32xf32>
    %6 = tpu.iota {dimensions = array<i32: 1>} : vector<1x8x8xi32>
    %7 = tpu.iota {dimensions = array<i32: 2>} : vector<1x8x8xi32>
    %8 = arith.cmpi slt, %6, %7 : vector<1x8x8xi32>
    %cst_3 = arith.constant 0xFF800000 : f32
    %cst_4 = arith.constant 0.000000e+00 : f32
    %9 = vector.broadcast %cst_3 : f32 to vector<1x8x8xf32>
    %10 = vector.broadcast %cst_4 : f32 to vector<1x8x8xf32>
    %11 = arith.select %8, %9, %10 : vector<1x8x8xi1>, vector<1x8x8xf32>
    %c0_5 = arith.constant 0 : index
    %c0_6 = arith.constant 0 : index
    %12 = vector.load %arg3[%c0_5, %c0_6] : memref<32x32xf32, #tpu.memory_space<vmem>>, vector<32x32xf32>
    %cst_7 = arith.constant 0.000000e+00 : f32
    %13 = vector.broadcast %cst_7 : f32 to vector<8x32xf32>
    %14 = vector.extract_strided_slice %3 {offsets = [0, 0], sizes = [8, 8], strides = [1, 1]} : vector<8x32xf32> to vector<8x8xf32>
    %15 = vector.shape_cast %14 : vector<8x8xf32> to vector<1x8x8xf32>
    %16 = vector.extract_strided_slice %5 {offsets = [0, 0], sizes = [8, 8], strides = [1, 1]} : vector<8x32xf32> to vector<8x8xf32>
    %17 = vector.shape_cast %16 : vector<8x8xf32> to vector<1x8x8xf32>
    %18 = vector.extract_strided_slice %4 {offsets = [0, 0], sizes = [8, 8], strides = [1, 1]} : vector<8x32xf32> to vector<8x8xf32>
    %19 = vector.shape_cast %18 : vector<8x8xf32> to vector<1x8x8xf32>
    "tpu.trace_start"() <{level = 10 : i32, message = "bsd,btd->bst"}> : () -> ()
    %cst_8 = arith.constant dense<0.000000e+00> : vector<1x8x8xf32>
    %20 = tpu.matmul %15, %17, %cst_8 {dimension_numbers = #tpu.dot_dimension_numbers<[2], [2], [1], [1], [0, 0, 0, 1, 1, 1], [0], [0]>} : vector<1x8x8xf32>, vector<1x8x8xf32>, vector<1x8x8xf32> -> vector<1x8x8xf32>
    "tpu.trace_stop"() : () -> ()
    %21 = arith.addf %20, %11 : vector<1x8x8xf32>
    %cst_9 = arith.constant dense<0xFF800000> : vector<1x8xf32>
    %22 = vector.multi_reduction <maximumf>, %21, %cst_9 [2] : vector<1x8x8xf32> to vector<1x8xf32>
    %23 = vector.shape_cast %22 : vector<1x8xf32> to vector<1x8x1xf32>
    %24 = vector.broadcast %23 : vector<1x8x1xf32> to vector<1x8x8xf32>
    %25 = arith.subf %21, %24 : vector<1x8x8xf32>
    %26 = math.exp %25 : vector<1x8x8xf32>
    %cst_10 = arith.constant dense<0.000000e+00> : vector<1x8xf32>
    %27 = vector.multi_reduction <add>, %26, %cst_10 [2] : vector<1x8x8xf32> to vector<1x8xf32>
    %28 = vector.shape_cast %27 : vector<1x8xf32> to vector<1x8x1xf32>
    %29 = vector.broadcast %28 : vector<1x8x1xf32> to vector<1x8x8xf32>
    %30 = arith.divf %26, %29 : vector<1x8x8xf32>
    "tpu.trace_start"() <{level = 10 : i32, message = "bst,btd->bsd"}> : () -> ()
    %cst_11 = arith.constant dense<0.000000e+00> : vector<1x8x8xf32>
    %31 = tpu.matmul %30, %19, %cst_11 {dimension_numbers = #tpu.dot_dimension_numbers<[2], [1], [1], [2], [0, 0, 0, 1, 1, 2], [0], [0]>} : vector<1x8x8xf32>, vector<1x8x8xf32>, vector<1x8x8xf32> -> vector<1x8x8xf32>
    "tpu.trace_stop"() : () -> ()
    %32 = vector.shape_cast %31 : vector<1x8x8xf32> to vector<8x8xf32>
    %33 = vector.extract_strided_slice %12 {offsets = [0, 0], sizes = [8, 32], strides = [1, 1]} : vector<32x32xf32> to vector<8x32xf32>
    %cst_12 = arith.constant dense<0.000000e+00> : vector<8x32xf32>
    %34 = tpu.matmul %32, %33, %cst_12 {dimension_numbers = #tpu.dot_dimension_numbers<[1], [0], [0], [1], [0, 0, 1, 1], [], []>} : vector<8x8xf32>, vector<8x32xf32>, vector<8x32xf32> -> vector<8x32xf32>
    %35 = arith.addf %13, %34 : vector<8x32xf32>
    %36 = vector.extract_strided_slice %3 {offsets = [0, 8], sizes = [8, 8], strides = [1, 1]} : vector<8x32xf32> to vector<8x8xf32>
    %37 = vector.shape_cast %36 : vector<8x8xf32> to vector<1x8x8xf32>
    %38 = vector.extract_strided_slice %5 {offsets = [0, 8], sizes = [8, 8], strides = [1, 1]} : vector<8x32xf32> to vector<8x8xf32>
    %39 = vector.shape_cast %38 : vector<8x8xf32> to vector<1x8x8xf32>
    %40 = vector.extract_strided_slice %4 {offsets = [0, 8], sizes = [8, 8], strides = [1, 1]} : vector<8x32xf32> to vector<8x8xf32>
    %41 = vector.shape_cast %40 : vector<8x8xf32> to vector<1x8x8xf32>
    "tpu.trace_start"() <{level = 10 : i32, message = "bsd,btd->bst"}> : () -> ()
    %cst_13 = arith.constant dense<0.000000e+00> : vector<1x8x8xf32>
    %42 = tpu.matmul %37, %39, %cst_13 {dimension_numbers = #tpu.dot_dimension_numbers<[2], [2], [1], [1], [0, 0, 0, 1, 1, 1], [0], [0]>} : vector<1x8x8xf32>, vector<1x8x8xf32>, vector<1x8x8xf32> -> vector<1x8x8xf32>
    "tpu.trace_stop"() : () -> ()
    %43 = arith.addf %42, %11 : vector<1x8x8xf32>
    %cst_14 = arith.constant dense<0xFF800000> : vector<1x8xf32>
    %44 = vector.multi_reduction <maximumf>, %43, %cst_14 [2] : vector<1x8x8xf32> to vector<1x8xf32>
    %45 = vector.shape_cast %44 : vector<1x8xf32> to vector<1x8x1xf32>
    %46 = vector.broadcast %45 : vector<1x8x1xf32> to vector<1x8x8xf32>
    %47 = arith.subf %43, %46 : vector<1x8x8xf32>
    %48 = math.exp %47 : vector<1x8x8xf32>
    %cst_15 = arith.constant dense<0.000000e+00> : vector<1x8xf32>
    %49 = vector.multi_reduction <add>, %48, %cst_15 [2] : vector<1x8x8xf32> to vector<1x8xf32>
    %50 = vector.shape_cast %49 : vector<1x8xf32> to vector<1x8x1xf32>
    %51 = vector.broadcast %50 : vector<1x8x1xf32> to vector<1x8x8xf32>
    %52 = arith.divf %48, %51 : vector<1x8x8xf32>
    "tpu.trace_start"() <{level = 10 : i32, message = "bst,btd->bsd"}> : () -> ()
    %cst_16 = arith.constant dense<0.000000e+00> : vector<1x8x8xf32>
    %53 = tpu.matmul %52, %41, %cst_16 {dimension_numbers = #tpu.dot_dimension_numbers<[2], [1], [1], [2], [0, 0, 0, 1, 1, 2], [0], [0]>} : vector<1x8x8xf32>, vector<1x8x8xf32>, vector<1x8x8xf32> -> vector<1x8x8xf32>
    "tpu.trace_stop"() : () -> ()
    %54 = vector.shape_cast %53 : vector<1x8x8xf32> to vector<8x8xf32>
    %55 = vector.extract_strided_slice %12 {offsets = [8, 0], sizes = [8, 32], strides = [1, 1]} : vector<32x32xf32> to vector<8x32xf32>
    %cst_17 = arith.constant dense<0.000000e+00> : vector<8x32xf32>
    %56 = tpu.matmul %54, %55, %cst_17 {dimension_numbers = #tpu.dot_dimension_numbers<[1], [0], [0], [1], [0, 0, 1, 1], [], []>} : vector<8x8xf32>, vector<8x32xf32>, vector<8x32xf32> -> vector<8x32xf32>
    %57 = arith.addf %35, %56 : vector<8x32xf32>
    %58 = vector.extract_strided_slice %3 {offsets = [0, 16], sizes = [8, 8], strides = [1, 1]} : vector<8x32xf32> to vector<8x8xf32>
    %59 = vector.shape_cast %58 : vector<8x8xf32> to vector<1x8x8xf32>
    %60 = vector.extract_strided_slice %5 {offsets = [0, 16], sizes = [8, 8], strides = [1, 1]} : vector<8x32xf32> to vector<8x8xf32>
    %61 = vector.shape_cast %60 : vector<8x8xf32> to vector<1x8x8xf32>
    %62 = vector.extract_strided_slice %4 {offsets = [0, 16], sizes = [8, 8], strides = [1, 1]} : vector<8x32xf32> to vector<8x8xf32>
    %63 = vector.shape_cast %62 : vector<8x8xf32> to vector<1x8x8xf32>
    "tpu.trace_start"() <{level = 10 : i32, message = "bsd,btd->bst"}> : () -> ()
    %cst_18 = arith.constant dense<0.000000e+00> : vector<1x8x8xf32>
    %64 = tpu.matmul %59, %61, %cst_18 {dimension_numbers = #tpu.dot_dimension_numbers<[2], [2], [1], [1], [0, 0, 0, 1, 1, 1], [0], [0]>} : vector<1x8x8xf32>, vector<1x8x8xf32>, vector<1x8x8xf32> -> vector<1x8x8xf32>
    "tpu.trace_stop"() : () -> ()
    %65 = arith.addf %64, %11 : vector<1x8x8xf32>
    %cst_19 = arith.constant dense<0xFF800000> : vector<1x8xf32>
    %66 = vector.multi_reduction <maximumf>, %65, %cst_19 [2] : vector<1x8x8xf32> to vector<1x8xf32>
    %67 = vector.shape_cast %66 : vector<1x8xf32> to vector<1x8x1xf32>
    %68 = vector.broadcast %67 : vector<1x8x1xf32> to vector<1x8x8xf32>
    %69 = arith.subf %65, %68 : vector<1x8x8xf32>
    %70 = math.exp %69 : vector<1x8x8xf32>
    %cst_20 = arith.constant dense<0.000000e+00> : vector<1x8xf32>
    %71 = vector.multi_reduction <add>, %70, %cst_20 [2] : vector<1x8x8xf32> to vector<1x8xf32>
    %72 = vector.shape_cast %71 : vector<1x8xf32> to vector<1x8x1xf32>
    %73 = vector.broadcast %72 : vector<1x8x1xf32> to vector<1x8x8xf32>
    %74 = arith.divf %70, %73 : vector<1x8x8xf32>
    "tpu.trace_start"() <{level = 10 : i32, message = "bst,btd->bsd"}> : () -> ()
    %cst_21 = arith.constant dense<0.000000e+00> : vector<1x8x8xf32>
    %75 = tpu.matmul %74, %63, %cst_21 {dimension_numbers = #tpu.dot_dimension_numbers<[2], [1], [1], [2], [0, 0, 0, 1, 1, 2], [0], [0]>} : vector<1x8x8xf32>, vector<1x8x8xf32>, vector<1x8x8xf32> -> vector<1x8x8xf32>
    "tpu.trace_stop"() : () -> ()
    %76 = vector.shape_cast %75 : vector<1x8x8xf32> to vector<8x8xf32>
    %77 = vector.extract_strided_slice %12 {offsets = [16, 0], sizes = [8, 32], strides = [1, 1]} : vector<32x32xf32> to vector<8x32xf32>
    %cst_22 = arith.constant dense<0.000000e+00> : vector<8x32xf32>
    %78 = tpu.matmul %76, %77, %cst_22 {dimension_numbers = #tpu.dot_dimension_numbers<[1], [0], [0], [1], [0, 0, 1, 1], [], []>} : vector<8x8xf32>, vector<8x32xf32>, vector<8x32xf32> -> vector<8x32xf32>
    %79 = arith.addf %57, %78 : vector<8x32xf32>
    %80 = vector.extract_strided_slice %3 {offsets = [0, 24], sizes = [8, 8], strides = [1, 1]} : vector<8x32xf32> to vector<8x8xf32>
    %81 = vector.shape_cast %80 : vector<8x8xf32> to vector<1x8x8xf32>
    %82 = vector.extract_strided_slice %5 {offsets = [0, 24], sizes = [8, 8], strides = [1, 1]} : vector<8x32xf32> to vector<8x8xf32>
    %83 = vector.shape_cast %82 : vector<8x8xf32> to vector<1x8x8xf32>
    %84 = vector.extract_strided_slice %4 {offsets = [0, 24], sizes = [8, 8], strides = [1, 1]} : vector<8x32xf32> to vector<8x8xf32>
    %85 = vector.shape_cast %84 : vector<8x8xf32> to vector<1x8x8xf32>
    "tpu.trace_start"() <{level = 10 : i32, message = "bsd,btd->bst"}> : () -> ()
    %cst_23 = arith.constant dense<0.000000e+00> : vector<1x8x8xf32>
    %86 = tpu.matmul %81, %83, %cst_23 {dimension_numbers = #tpu.dot_dimension_numbers<[2], [2], [1], [1], [0, 0, 0, 1, 1, 1], [0], [0]>} : vector<1x8x8xf32>, vector<1x8x8xf32>, vector<1x8x8xf32> -> vector<1x8x8xf32>
    "tpu.trace_stop"() : () -> ()
    %87 = arith.addf %86, %11 : vector<1x8x8xf32>
    %cst_24 = arith.constant dense<0xFF800000> : vector<1x8xf32>
    %88 = vector.multi_reduction <maximumf>, %87, %cst_24 [2] : vector<1x8x8xf32> to vector<1x8xf32>
    %89 = vector.shape_cast %88 : vector<1x8xf32> to vector<1x8x1xf32>
    %90 = vector.broadcast %89 : vector<1x8x1xf32> to vector<1x8x8xf32>
    %91 = arith.subf %87, %90 : vector<1x8x8xf32>
    %92 = math.exp %91 : vector<1x8x8xf32>
    %cst_25 = arith.constant dense<0.000000e+00> : vector<1x8xf32>
    %93 = vector.multi_reduction <add>, %92, %cst_25 [2] : vector<1x8x8xf32> to vector<1x8xf32>
    %94 = vector.shape_cast %93 : vector<1x8xf32> to vector<1x8x1xf32>
    %95 = vector.broadcast %94 : vector<1x8x1xf32> to vector<1x8x8xf32>
    %96 = arith.divf %92, %95 : vector<1x8x8xf32>
    "tpu.trace_start"() <{level = 10 : i32, message = "bst,btd->bsd"}> : () -> ()
    %cst_26 = arith.constant dense<0.000000e+00> : vector<1x8x8xf32>
    %97 = tpu.matmul %96, %85, %cst_26 {dimension_numbers = #tpu.dot_dimension_numbers<[2], [1], [1], [2], [0, 0, 0, 1, 1, 2], [0], [0]>} : vector<1x8x8xf32>, vector<1x8x8xf32>, vector<1x8x8xf32> -> vector<1x8x8xf32>
    "tpu.trace_stop"() : () -> ()
    %98 = vector.shape_cast %97 : vector<1x8x8xf32> to vector<8x8xf32>
    %99 = vector.extract_strided_slice %12 {offsets = [24, 0], sizes = [8, 32], strides = [1, 1]} : vector<32x32xf32> to vector<8x32xf32>
    %cst_27 = arith.constant dense<0.000000e+00> : vector<8x32xf32>
    %100 = tpu.matmul %98, %99, %cst_27 {dimension_numbers = #tpu.dot_dimension_numbers<[1], [0], [0], [1], [0, 0, 1, 1], [], []>} : vector<8x8xf32>, vector<8x32xf32>, vector<8x32xf32> -> vector<8x32xf32>
    %101 = arith.addf %79, %100 : vector<8x32xf32>
    %c0_28 = arith.constant 0 : index
    %c0_29 = arith.constant 0 : index
    %102 = vector.load %arg4[%c0_28, %c0_29] : memref<8x32xf32, #tpu.memory_space<vmem>>, vector<8x32xf32>
    tpu.vector_store %arg4[%c0_28, %c0_29], %101 {strides = array<i32>} : memref<8x32xf32, #tpu.memory_space<vmem>>, vector<8x32xf32>,
    return
  }
  func.func @transform_0(%arg0: i32) -> (i32, i32) {
    %c0_i32 = arith.constant 0 : i32
    %c0_i32_0 = arith.constant 0 : i32
    return %arg0, %c0_i32 : i32, i32
  }
  func.func @transform_1(%arg0: i32) -> (i32, i32) {
    %c0_i32 = arith.constant 0 : i32
    %c0_i32_0 = arith.constant 0 : i32
    %c0_i32_1 = arith.constant 0 : i32
    return %c0_i32, %c0_i32_0 : i32, i32
  }
  func.func @transform_2(%arg0: i32) -> (i32, i32) {
    %c0_i32 = arith.constant 0 : i32
    %c0_i32_0 = arith.constant 0 : i32
    %c0_i32_1 = arith.constant 0 : i32
    return %c0_i32, %c0_i32_0 : i32, i32
  }
  func.func @transform_3(%arg0: i32) -> (i32, i32) {
    %c0_i32 = arith.constant 0 : i32
    %c0_i32_0 = arith.constant 0 : i32
    return %arg0, %c0_i32 : i32, i32
  }
}

</mosaic_0001>

<bundles_post_ra>
// kernel: tpu_custom_call.1
= control target key start
LH: loop header
LB: loop body
LE: loop exit
PB: predicated region body
PF: predicated region fallthrough
CT: control target
= control target key end

     0   :  { %8 = vsyncpa [#allocation3], 0  ;;  %s2046_s0 = inlined_call_operand.hbm [shape: f32[16,32], index: 0, kind: input, shape index: {}]   ;;  %s2047_s1 = inlined_call_operand.hbm [shape: f32[32,96], index: 1, kind: input, shape index: {}]   ;;  %s2048_s2 = inlined_call_operand.hbm [shape: f32[32,32], index: 2, kind: input, shape index: {}]   ;;  %s2049_s3 = inlined_call_operand.hbm [shape: f32[16,32], index: 3, kind: output, shape index: {}]  }
   0x1   :  { %10 = vsyncpa [#allocation3 + $0x1], 0 }
   0x2   :  { %11 = vsyncpa [#allocation6], 0 }
   0x3   :  { %12 = vsyncpa [#allocation4], 0 }
   0x4   :  { %14 = vsyncpa [#allocation4 + $0x1], 0  ;;  %s1782_s12 = smov 0   ;;  %s1784_s13 = smov 0  }
   0x5   :  { %s1786_s14 = smov 0   ;;  %s1788_s15 = smov 0  }
   0x6 LB: > { %s1803_s16 = sadd.s32 4294967295, %s1741_s15   ;;  %s1362_s17 = sadd.s32 4294967294, %s1741_s15   ;;  %s1741_s15 = sphi %s1788_s15, %s2071_s15   ;;  %s1737_s14 = sphi %s1786_s14, %s2070_s14   ;;  %s1733_s13 = sphi %s1784_s13, %s2069_s13   ;;  %s1729_s12 = sphi %s1782_s12, %s2068_s12  }
   0x7   : > { %p40_p0 = scmp.ne.s32.totalorder %s1733_s13, %s1729_s12  ;;  %p2050_p1 = scmp.eq.s32.totalorder %s1803_s16, 0 }
   0x8   : > { %p112_p3 = scmp.eq.s32.totalorder %s1362_s17, 1  ;;  %p1363_p5 = scmp.ge.s32.totalorder %s1741_s15, 1 }
   0x9   : > { %p1812_p4 = por %p2050_p1, %p40_p0  ;;  %p119_p7 = scmp.lt.s32.totalorder %s1741_s15, 3 }
   0xa   : > { %p1817_p6 = por %p112_p3, %p40_p0  ;;  %s1743_s21 = smov [#allocation5]  }
   0xb   : > { %s2054_s18 = scalar_select %p1812_p4, 1, 0 }
   0xc   : > { %s2055_s19 = scalar_select %p1817_p6, 1, 0 }
   0xd   : > { %p1822_p8 = pnand %p1363_p5, %p119_p7  ;;  %s131_s22 = sshll.u32 %s1743_s21, 4  ;;  %s132_s22 = int_to_ptr.vmem [resolvable:$true] %s131_s22 }
   0xe   : > { %s1744_s24 = smov [#allocation7]   ;;  %s1604_s26 = scalar_lea.vmem %s132_s22, 512 }
   0xf   : > { %s2056_s20 = scalar_select %p1822_p8, 1, 0 }
  0x10   : > { %p1507_p9 = pneg %p1822_p8  ;;  %s144_s25 = sshll.u32 %s1744_s24, 4  ;;  %s145_s25 = int_to_ptr.vmem [resolvable:$true] %s144_s25 }
  0x11   : > { %p1605_p13 = scmp.ne.s32.totalorder %s132_s22, %s1604_s26  ;;  %p1612_p5 = scmp.lt.s32.totalorder %s132_s22, %s132_s22 }
  0x12   : > { %p1831_p11 = pnand %p1507_p9, %p2050_p1  ;;  %p1613_p7 = scmp.lt.s32.totalorder %s1604_s26, %s1604_s26 }
  0x14   : > { %p1595_p12 = pneg %p1831_p11  ;;  %p1614_p10 = por %p1613_p7, %p1612_p5 }
  0x16   : > { %p1607_p0 = pnand %p1605_p13, %p1595_p12 }
  0x18   : > { %p1608_p3 = pneg %p1607_p0 }
  0x1a   : > { %p1615_p9 = pnand %p1614_p10, %p1608_p3 }
  0x1c   : > { %1618 = shalt.err (!%p1615_p9)
}
  0x1d   : > { %s1745_s27 = smov 128   ;;  %s1746_s28 = smov 8  }
  0x1e   : > { %1510 = dma.hbm_to_vmem [thread:$0]  (!%p1831_p11), %s2047_s1, 512, %s132_s22, [#allocation6], %s1745_s27, %s1745_s27, %s1746_s28  }
  0x1f   : > { %s1630_s4 = scalar_lea.vmem %s145_s25, 512  ;;  %p1638_p2 = scmp.lt.s32.totalorder %s145_s25, %s145_s25 }
  0x20   : > { %p1631_p1 = scmp.ne.s32.totalorder %s145_s25, %s1630_s4  ;;  %p1639_p6 = scmp.lt.s32.totalorder %s1630_s4, %s1630_s4 }
  0x22   : > { %p1633_p13 = pnand %p1631_p1, %p1595_p12  ;;  %p1640_p5 = por %p1639_p6, %p1638_p2 }
  0x24   : > { %p1634_p0 = pneg %p1633_p13 }
  0x26   : > { %p1641_p10 = pnand %p1640_p5, %p1634_p0 }
  0x28   : > { %1644 = shalt.err (!%p1641_p10)
}
  0x29   : > { %1513 = dma.hbm_to_vmem [thread:$0]  (!%p1831_p11), %s2048_s2, 512, %s145_s25, [#allocation6], %s1745_s27, %s1745_s27, %s1746_s28  }
  0x2a   : > { %s1854_s7 = sadd.s32 1, %s1741_s15   ;;  %s27_s8 = sadd.s32 1, %s1737_s14 }
  0x2b   : > { %s24_s9 = ssub.s32 %s1741_s15, %s1854_s7  ;;  %p34_p1 = scmp.ne.s32.totalorder %s1737_s14, %s1733_s13 }
  0x2c   : > { %p25_p2 = scmp.eq.s32.totalorder %s24_s9, 0  ;;  %p35_p6 = scmp.eq.s32.totalorder %s1741_s15, 0 }
  0x2d   : > { %p2058_p12 = scmp.eq.s32.totalorder %s1803_s16, 1  ;;  %p1524_p7 = scmp.lt.s32.totalorder %s1741_s15, 2 }
  0x2e   : > { %s1870_s11 = scalar_select %p25_p2, %s1737_s14, %s27_s8  }
  0x2f   : > { %p1864_p3 = por %p2058_p12, %p34_p1  ;;  %p36_p9 = por %p35_p6, %p34_p1 }
  0x30   : > { %s158_s17 = sand.u32 1, %s1737_s14   ;;  %s1368_s22 = sshll.u32 %s1741_s15, 7 }
  0x31   : > { %s2059_s10 = scalar_select %p1864_p3, 1, 0 }
  0x32   : > { %s1367_s21 = sshll.u32 %s158_s17, 3  ;;  %s1877_s25 = scalar_lea.hbm %s2046_s0, %s1368_s22 }
  0x33   : > { %s162_s26 = scalar_lea.vmem [#allocation2], %s1367_s21  ;;  %p1879_p11 = pnand %p1524_p7, %p36_p9 }
  0x34   : > { %s169_s27 = sshll.u32 %s162_s26, 4  ;;  %s159_s29 = scalar_lea.sflag [#allocation3], %s158_s17  ;;  %s170_s27 = int_to_ptr.vmem [resolvable:$true] %s169_s27 }
  0x35   : > { %s1645_s30 = scalar_lea.hbm %s1877_s25, 128  ;;  %p1647_p0 = pneg %p1879_p11 }
  0x36   : > { %p1646_p13 = scmp.ne.s32.totalorder %s1877_s25, %s1645_s30  ;;  %s1650_s6 = scalar_lea.hbm %s2046_s0, 256 }
  0x37   : > { %p1651_p1 = scmp.lt.s32.totalorder %s1877_s25, %s2046_s0  ;;  %p1652_p2 = scmp.lt.s32.totalorder %s1650_s6, %s1645_s30 }
  0x38   : > { %p1648_p5 = pnand %p1647_p0, %p1646_p13 }
  0x39   : > { %p1653_p6 = por %p1652_p2, %p1651_p1 }
  0x3a   : > { %p1649_p10 = pneg %p1648_p5 }
  0x3c   : > { %p1654_p12 = pnand %p1653_p6, %p1649_p10 }
  0x3e   : > { %1657 = shalt.err (!%p1654_p12)
}
  0x3f   : > { %s1658_s21 = scalar_lea.vmem %s170_s27, 128  ;;  %s1747_s17 = smov [#allocation2]  }
  0x40   : > { %p1659_p7 = scmp.ne.s32.totalorder %s170_s27, %s1658_s21  ;;  %s1663_s22 = sshll.u32 %s1747_s17, 4  ;;  %s1664_s22 = int_to_ptr.vmem [resolvable:$false] %s1663_s22 }
  0x41   : > { %s1665_s23 = scalar_lea.vmem %s1664_s22, 256  ;;  %p1666_p13 = scmp.lt.s32.totalorder %s170_s27, %s1664_s22 }
  0x42   : > { %p1661_p9 = pnand %p1659_p7, %p1647_p0  ;;  %p1667_p5 = scmp.lt.s32.totalorder %s1665_s23, %s1658_s21 }
  0x44   : > { %p1662_p3 = pneg %p1661_p9  ;;  %p1668_p4 = por %p1667_p5, %p1666_p13 }
  0x46   : > { %p1669_p8 = pnand %p1668_p4, %p1662_p3 }
  0x48   : > { %1672 = shalt.err (!%p1669_p8)
}
  0x49   : > { %1517 = dma.hbm_to_vmem [thread:$0]  (!%p1879_p11), %s1877_s25, 128, %s170_s27, %s159_s29  }
  0x4a   : > { %p2061_p10 = scmp.ne.s32.totalorder %s2056_s20, 0 }
  0x4b   : > { %s1900_s24 = sand.u32 (!%p2061_p10), 1, %s1733_s13   ;;  %p2062_p4 = scmp.ne.s32.totalorder (!%p2061_p10), %s2054_s18, 0 }
  0x4c   : > { %178 = sbr.rel (%p2061_p10) target bundleno = 2533 (0x9e5), region = 32  ;;  %s1370_s26 = sshll.u32 (!%p2061_p10), %s1900_s24, 3 }
  0x4d   : > { %s181_s30 = scalar_lea.sflag (!%p2061_p10), [#allocation3], %s1900_s24  ;;  %s184_s4 = scalar_lea.vmem (!%p2061_p10), [#allocation2], %s1370_s26 }
  0x51   : > { %1716 = dma.done.wait (%p2062_p4), %s181_s30, 128  }
  0x52   : > { %1718 = vsyncadd (%p2062_p4), %s181_s30, 4294967168  ;;  %p2063_p8 = scmp.eq.s32.totalorder %s1803_s16, 0 }
  0x54   : > { %1720 = dma.done.wait (%p2063_p8), [#allocation6], 1024   ;;  %p2064_p3 = pmov %p2063_p8 }
  0x55   : > { %v1748_v0 = vmov 0.0   ;;  %vm1749_vm0 = vmmov 0   ;;  %v219_v1 = vld [vmem:[#allocation5 + $0x18] sm:$0xff]  ;;  %v218_v2 = vld [vmem:[#allocation5 + $0x10] sm:$0xff]  ;;  %v217_v3 = vld [vmem:[#allocation5 + $0x8] sm:$0xff]  ;;  %vm220_vm1 = vcmask 261120   ;;  %v294_v11 = vlaneseq }
  0x56   : > { %1722 = vsyncadd (%p2064_p3), [#allocation6], 4294966272  ;;  %1424 = vmatprep.subr.mxu0 %v1748_v0  ;;  %1432 = vmatprep.mubr.msk.f32.mxu0 %vm1749_vm0, %v1748_v0  ;;  %v216_v4 = vld [vmem:[#allocation5] sm:$0xff]  ;;  %v215_v5 = vld [vmem:[%s184_s4] sm:$0xff]  ;;  %s1750_s18 = smov 120   ;;  %s1751_s20 = smov 64  }
  0x57   : > { %1435 = vmatprep.subr.mxu1 %v1748_v0  ;;  %1437 = vmatprep.mubr.msk.f32.mxu1 %vm1749_vm0, %v1748_v0  ;;  %s1752_s25 = smov 56   ;;  %vm307_vm2 = vcmask 64512   ;;  %v295_v12 = vshrl.u32 %v294_v11, 7  ;;  %v297_v13 = vand.u32 127, %v294_v11  ;;  %s1753_s27 = smov 88   ;;  %v300_v41 = vld [vmem:[#allocation7] sm:$0xff] }
  0x58   : > { %1425 = vmatpush3.msra.mxu0 %v219_v1  ;;  %s1754_s28 = smov 96   ;;  %s1755_s29 = smov 48   ;;  %v301_v42 = vld [vmem:[#allocation7 + $0x8] sm:$0xff] }
  0x59   : > { %1426 = vmatprep.subr.mxu0 %v1748_v0  ;;  %vm298_vm3 = vcmp.lt.s32.totalorder %v295_v12, %v297_v13  ;;  %s1756_s5 = smov 112   ;;  %s1757_s6 = smov 40  }
  0x5a   : > { %1427 = vmatpush3.msra.mxu0 %v218_v2  ;;  %v1944_v14 = vsel %vm298_vm3, -inf, %v1748_v0  ;;  %s1758_s8 = smov 104   ;;  %s1759_s9 = smov 80  }
  0x5b   : > { %1428 = vmatprep.subr.mxu0 %v1748_v0  ;;  %s1760_s21 = smov 72   ;;  %s1392_s17 = sshll.u32 %s1803_s16, 7 }
  0x5c   : > { %1429 = vmatpush3.msra.mxu0 %v217_v3  ;;  %s214_s22 = scalar_lea.vmem [#allocation8], %s1370_s26  ;;  %p2065_p0 = scmp.ne.s32.totalorder %s2059_s10, 0 }
  0x5d   : > { %1430 = vmatprep.subr.mxu0 %v1748_v0  ;;  %s1273_s23 = sshll.u32 %s214_s22, 4  ;;  %s1761_s16 = smov [#allocation8]   ;;  %s1274_s23 = int_to_ptr.vmem [resolvable:$true] %s1273_s23 }
  0x5e   : > { %1431 = vmatpush3.msra.mxu0 %v216_v4  ;;  %s1677_s26 = sshll.u32 %s1761_s16, 4  ;;  %s1678_s26 = int_to_ptr.vmem [resolvable:$false] %s1677_s26 }
  0x5f   : > { %1433 = vmatmul.mubr.msk.f32.vlgmr.msra.gmra.mxu0 %vm220_vm1, %v215_v5  ;;  %1445 = vmatprep.subr.mxu0 %v1748_v0  ;;  %p1680_p6 = scmp.lt.s32.totalorder %s1274_s23, %s1678_s26 }
  0x60   : > { %1447 = vmatprep.mubr.msk.f32.mxu0 %vm1749_vm0, %v1748_v0 }
 0x11f   : > { %v1927_v6 = vpop.f32.mrf.mxu0 }
 0x120   : > { %469 = vrot.lane.b32.xlu1 %v1927_v6, %s1750_s18  ;;  %305 = vrot.lane.b32.xlu0 %v1927_v6, %s1751_s20  ;;  %s2008_s18 = scalar_lea.hbm %s2049_s3, %s1392_s17  ;;  %s1260_s20 = scalar_lea.sflag [#allocation4], %s1900_s24 }
 0x121   : > { %v1434_v7 = vpop.f32.mrf.mxu0 }
 0x122   : > { %v302_v7 = vld [vmem:[#allocation7 + $0x10] sm:$0xff] }
 0x124   : > { %471 = vrot.lane.b32.xlu0 %v1927_v6, %s1752_s25  ;;  %s1673_s25 = scalar_lea.vmem %s1274_s23, 128 }
 0x125   : > { %p1674_p11 = scmp.ne.s32.totalorder %s1274_s23, %s1673_s25 }
 0x127   : > { %p1675_p1 = pnand %p1674_p11, %p2065_p0 }
 0x129   : > { %p1676_p2 = pneg %p1675_p1 }
 0x192   : > { %v306_v8 = vpop.permute.xlu0 %305  ;;  %v470_v10 = vpop.permute.xlu1 %469 }
 0x193   : > { %1436 = vmatpush3.xpose.msk.msra.mxu1 %vm307_vm2, %v306_v8 }
 0x194   : > { %1440 = vmatprep.subr.mxu1 %v1748_v0 }
 0x196   : > { %1438 = vmatmul.mubr.msk.f32.vlgmr.msra.gmra.mxu1 %vm307_vm2, %v1927_v6  ;;  %v472_v9 = vpop.permute.xlu0 %471 }
 0x197   : > { %1446 = vmatpush3.xpose.msk.msra.mxu0 %vm307_vm2, %v472_v9  ;;  %1442 = vmatprep.mubr.msk.f32.mxu1 %vm1749_vm0, %v1748_v0 }
 0x198   : > { %1455 = vmatprep.subr.mxu0 %v1748_v0 }
 0x19a   : > { %1448 = vmatmul.mubr.msk.f32.vlgmr.msra.gmra.mxu0 %vm307_vm2, %v470_v10 }
 0x19b   : > { %1457 = vmatprep.mubr.msk.f32.mxu0 %vm1749_vm0, %v1748_v0  ;;  %1456 = vmatpush3.msra.mxu0 %v301_v42 }
 0x19c   : > { %1465 = vmatprep.subr.mxu0 %v1748_v0 }
 0x256   : > { %v378_v15 = vpop.f32.mrf.mxu1 }
 0x257   : > { %v379_v16 = vadd.f32 %v378_v15, %v1944_v14 }
 0x258   : > { %v1439_v17 = vpop.f32.mrf.mxu1 }
 0x259   : > { %v382_v18 = vsel %vm307_vm2, %v379_v16, -inf }
 0x25a   : > { %383 = vmax.xlane.f32.xlu1 %v382_v18  ;;  %v543_v19 = vpop.f32.mrf.mxu0 }
 0x25b   : > { %v544_v20 = vadd.f32 %v543_v19, %v1944_v14 }
 0x25c   : > { %v1449_v21 = vpop.f32.mrf.mxu0 }
 0x25d   : > { %v547_v22 = vsel %vm307_vm2, %v544_v20, -inf }
 0x25e   : > { %548 = vmax.xlane.f32.xlu0 %v547_v22 }
 0x2e3   : > { %v384_v23 = vpop.xlane.xlu1 %383 }
 0x2e4   : > { %v385_v24 = vsub.f32 %v379_v16, %v384_v23 }
 0x2e6   : > { %v386_v25 = vmul.f32 1.442695, %v385_v24 }
 0x2e7   : > { %v549_v26 = vpop.xlane.xlu0 %548 }
 0x2e8   : > { %1577 = vpow2.f32 %v386_v25  ;;  %v550_v27 = vsub.f32 %v544_v20, %v549_v26 }
 0x2ea   : > { %v551_v28 = vmul.f32 1.442695, %v550_v27 }
 0x2ec   : > { %1579 = vpow2.f32 %v551_v28 }
 0x2f5   : > { %v1578_v29 = vpop.eup %1577 }
 0x2f6   : > { %v388_v30 = vsel %vm307_vm2, %v1578_v29, 0.0 }
 0x2f7   : > { %389 = vadd.xlane.f32.xlu0 %v388_v30 }
 0x2f9   : > { %v1580_v31 = vpop.eup %1579 }
 0x2fa   : > { %v553_v32 = vsel %vm307_vm2, %v1580_v31, 0.0 }
 0x2fb   : > { %554 = vadd.xlane.f32.xlu1 %v553_v32 }
 0x30c   : > { %558 = vrot.lane.b32.xlu1 %v1927_v6, %s1753_s27  ;;  %s1679_s27 = scalar_lea.vmem %s1678_s26, 256 }
 0x30d   : > { %393 = vrot.lane.b32.xlu0 %v1927_v6, %s1754_s28  ;;  %p1681_p12 = scmp.lt.s32.totalorder %s1679_s27, %s1673_s25 }
 0x30f   : > { %p1682_p7 = por %p1681_p12, %p1680_p6 }
 0x310   : > { %782 = vrot.lane.b32.xlu1 %v1927_v6, %s1755_s29 }
 0x311   : > { %780 = vrot.lane.b32.xlu0 %v1927_v6, %s1756_s5  ;;  %p1683_p9 = pnand %p1682_p7, %p1676_p2 }
 0x380   : > { %v390_v33 = vpop.xlane.xlu0 %389 }
 0x381   : > { %1581 = vrcp.f32 %v390_v33 }
 0x384   : > { %v555_v34 = vpop.xlane.xlu1 %554  ;;  %v394_v35 = vpop.permute.xlu0 %393 }
 0x385   : > { %1583 = vrcp.f32 %v555_v34  ;;  %1441 = vmatpush3.msra.mxu1 %v394_v35 }
 0x386   : > { %1450 = vmatprep.subr.mxu1 %v1748_v0 }
 0x388   : > { %v559_v38 = vpop.permute.xlu1 %558  ;;  %v781_v48 = vpop.permute.xlu0 %780 }
 0x38c   : > { %v783_v46 = vpop.permute.xlu1 %782 }
 0x38e   : > { %v1582_v36 = vpop.eup %1581 }
 0x38f   : > { %v392_v37 = vmul.f32 %v1582_v36, %v1578_v29 }
 0x391   : > { %1443 = vmatmul.mubr.msk.f32.vlgmr.msra.gmra.mxu1 %vm307_vm2, %v392_v37 }
 0x392   : > { %v1584_v39 = vpop.eup %1583  ;;  %1451 = vmatpush3.msra.mxu1 %v559_v38  ;;  %1452 = vmatprep.mubr.msk.f32.mxu1 %vm1749_vm0, %v1748_v0 }
 0x393   : > { %v557_v40 = vmul.f32 %v1584_v39, %v1580_v31  ;;  %1460 = vmatprep.subr.mxu1 %v1748_v0 }
 0x395   : > { %1453 = vmatmul.mubr.msk.f32.vlgmr.msra.gmra.mxu1 %vm307_vm2, %v557_v40 }
 0x396   : > { %1462 = vmatprep.mubr.msk.f32.mxu1 %vm1749_vm0, %v1748_v0  ;;  %1461 = vmatpush3.msra.mxu1 %v300_v41 }
 0x397   : > { %1470 = vmatprep.subr.mxu1 %v1748_v0 }
 0x451   : > { %v465_v43 = vpop.f32.mrf.mxu1 }
 0x452   : > { %1463 = vmatmul.mubr.msk.f32.vlgmr.msra.gmra.mxu1 %vm307_vm2, %v465_v43 }
 0x453   : > { %v1444_v44 = vpop.f32.mrf.mxu1  ;;  %1472 = vmatprep.mubr.msk.f32.mxu1 %vm1749_vm0, %v1748_v0 }
 0x455   : > { %v630_v45 = vpop.f32.mrf.mxu1 }
 0x456   : > { %1458 = vmatmul.mubr.msk.f32.vlgmr.msra.gmra.mxu0 %vm307_vm2, %v630_v45 }
 0x457   : > { %1466 = vmatpush3.xpose.msk.msra.mxu0 %vm307_vm2, %v783_v46  ;;  %v1454_v47 = vpop.f32.mrf.mxu1  ;;  %1467 = vmatprep.mubr.msk.f32.mxu0 %vm1749_vm0, %v1748_v0 }
 0x458   : > { %1475 = vmatprep.subr.mxu0 %v1748_v0 }
 0x45a   : > { %1468 = vmatmul.mubr.msk.f32.vlgmr.msra.gmra.mxu0 %vm307_vm2, %v781_v48 }
 0x45b   : > { %1477 = vmatprep.mubr.msk.f32.mxu0 %vm1749_vm0, %v1748_v0  ;;  %1476 = vmatpush3.msra.mxu0 %v302_v7 }
 0x45c   : > { %1485 = vmatprep.subr.mxu0 %v1748_v0 }
 0x512   : > { %v776_v49 = vpop.f32.mrf.mxu1 }
 0x514   : > { %v1464_v50 = vpop.f32.mrf.mxu1 }
 0x516   : > { %v703_v51 = vpop.f32.mrf.mxu0 }
 0x517   : > { %v777_v52 = vadd.f32 %v776_v49, %v703_v51 }
 0x518   : > { %v1459_v53 = vpop.f32.mrf.mxu0 }
 0x51a   : > { %v854_v54 = vpop.f32.mrf.mxu0 }
 0x51b   : > { %v855_v55 = vadd.f32 %v854_v54, %v1944_v14 }
 0x51c   : > { %v1469_v56 = vpop.f32.mrf.mxu0 }
 0x51d   : > { %v858_v57 = vsel %vm307_vm2, %v855_v55, -inf }
 0x51e   : > { %859 = vmax.xlane.f32.xlu1 %v858_v57 }
 0x52f   : > { %1021 = vrot.lane.b32.xlu1 %v1927_v6, %s1757_s6 }
 0x533   : > { %1019 = vrot.lane.b32.xlu1 %v1927_v6, %s1758_s8 }
 0x5a7   : > { %v860_v58 = vpop.xlane.xlu1 %859 }
 0x5a8   : > { %v861_v59 = vsub.f32 %v855_v55, %v860_v58 }
 0x5aa   : > { %v862_v60 = vmul.f32 1.442695, %v861_v59 }
 0x5ab   : > { %v1022_v3 = vpop.permute.xlu1 %1021 }
 0x5ac   : > { %1585 = vpow2.f32 %v862_v60 }
 0x5af   : > { %v1020_v5 = vpop.permute.xlu1 %1019 }
 0x5b9   : > { %v1586_v61 = vpop.eup %1585 }
 0x5ba   : > { %v864_v62 = vsel %vm307_vm2, %v1586_v61, 0.0 }
 0x5bb   : > { %865 = vadd.xlane.f32.xlu0 %v864_v62 }
 0x5d1   : > { %869 = vrot.lane.b32.xlu0 %v1927_v6, %s1759_s9 }
 0x644   : > { %v866_v63 = vpop.xlane.xlu0 %865 }
 0x645   : > { %1587 = vrcp.f32 %v866_v63 }
 0x648   : > { %v870_v1 = vpop.permute.xlu0 %869 }
 0x649   : > { %1471 = vmatpush3.msra.mxu1 %v870_v1 }
 0x64a   : > { %1480 = vmatprep.subr.mxu1 %v1748_v0 }
 0x652   : > { %v1588_v2 = vpop.eup %1587 }
 0x653   : > { %v868_v4 = vmul.f32 %v1588_v2, %v1586_v61 }
 0x655   : > { %1473 = vmatmul.mubr.msk.f32.vlgmr.msra.gmra.mxu1 %vm307_vm2, %v868_v4 }
 0x656   : > { %1481 = vmatpush3.xpose.msk.msra.mxu1 %vm307_vm2, %v1022_v3  ;;  %1482 = vmatprep.mubr.msk.f32.mxu1 %vm1749_vm0, %v1748_v0 }
 0x657   : > { %1490 = vmatprep.subr.mxu1 %v1748_v0 }
 0x659   : > { %1483 = vmatmul.mubr.msk.f32.vlgmr.msra.gmra.mxu1 %vm307_vm2, %v1020_v5 }
 0x65a   : > { %1492 = vmatprep.mubr.msk.f32.mxu1 %vm1749_vm0, %v1748_v0 }
 0x715   : > { %v941_v8 = vpop.f32.mrf.mxu1 }
 0x716   : > { %1478 = vmatmul.mubr.msk.f32.vlgmr.msra.gmra.mxu0 %vm307_vm2, %v941_v8 }
 0x717   : > { %v1474_v9 = vpop.f32.mrf.mxu1  ;;  %1487 = vmatprep.mubr.msk.f32.mxu0 %vm1749_vm0, %v1748_v0 }
 0x719   : > { %v1093_v10 = vpop.f32.mrf.mxu1 }
 0x71a   : > { %v1094_v11 = vadd.f32 %v1093_v10, %v1944_v14  ;;  %v303_v14 = vld [vmem:[#allocation7 + $0x18] sm:$0xff] }
 0x71b   : > { %v1484_v12 = vpop.f32.mrf.mxu1  ;;  %1491 = vmatpush3.msra.mxu1 %v303_v14 }
 0x71c   : > { %v1097_v13 = vsel %vm307_vm2, %v1094_v11, -inf }
 0x71d   : > { %1098 = vmax.xlane.f32.xlu0 %v1097_v13 }
 0x733   : > { %1108 = vrot.lane.b32.xlu0 %v1927_v6, %s1760_s21 }
 0x7a6   : > { %v1099_v15 = vpop.xlane.xlu0 %1098 }
 0x7a7   : > { %v1100_v16 = vsub.f32 %v1094_v11, %v1099_v15 }
 0x7a9   : > { %v1101_v17 = vmul.f32 1.442695, %v1100_v16 }
 0x7aa   : > { %v1109_v18 = vpop.permute.xlu0 %1108 }
 0x7ab   : > { %1589 = vpow2.f32 %v1101_v17  ;;  %1486 = vmatpush3.msra.mxu0 %v1109_v18 }
 0x7b8   : > { %v1590_v19 = vpop.eup %1589 }
 0x7b9   : > { %v1103_v0 = vsel %vm307_vm2, %v1590_v19, 0.0 }
 0x7ba   : > { %1104 = vadd.xlane.f32.xlu1 %v1103_v0 }
 0x7d6   : > { %v1014_v20 = vpop.f32.mrf.mxu0 }
 0x7d7   : > { %v1018_v21 = vadd.f32 %v1014_v20, %v777_v52 }
 0x7d8   : > { %v1479_v22 = vpop.f32.mrf.mxu0 }
 0x843   : > { %v1105_v23 = vpop.xlane.xlu1 %1104 }
 0x844   : > { %1591 = vrcp.f32 %v1105_v23 }
 0x851   : > { %v1592_v6 = vpop.eup %1591 }
 0x852   : > { %v1107_v24 = vmul.f32 %v1592_v6, %v1590_v19 }
 0x854   : > { %1488 = vmatmul.mubr.msk.f32.vlgmr.msra.gmra.mxu0 %vm307_vm2, %v1107_v24 }
 0x914   : > { %v1180_v25 = vpop.f32.mrf.mxu0 }
 0x915   : > { %1493 = vmatmul.mubr.msk.f32.vlgmr.msra.gmra.mxu1 %vm307_vm2, %v1180_v25 }
 0x916   : > { %v1489_v26 = vpop.f32.mrf.mxu0 }
 0x9d5   : > { %v1253_v27 = vpop.f32.mrf.mxu1 }
 0x9d6   : > { %v1257_v28 = vadd.f32 %v1253_v27, %v1018_v21 }
 0x9d7   : > { %v1494_v29 = vpop.f32.mrf.mxu1 }
 0x9d8   : > { %1258 = vst.msk [vmem:[%s214_s22] sm:$0xff] %vm220_vm1, %v1257_v28 }
 0x9d9   : > { %1686 = shalt.err (!%p1683_p9)
}
 0x9da   : > { %s1687_s28 = scalar_lea.hbm %s2008_s18, 128  ;;  %s1691_s5 = scalar_lea.hbm %s2049_s3, 256 }
 0x9db   : > { %p1688_p13 = scmp.ne.s32.totalorder %s2008_s18, %s1687_s28  ;;  %p1692_p4 = scmp.lt.s32.totalorder %s2008_s18, %s2049_s3 }
 0x9dc   : > { %p1693_p8 = scmp.lt.s32.totalorder %s1691_s5, %s1687_s28 }
 0x9dd   : > { %p1689_p5 = pnand %p1688_p13, %p2065_p0 }
 0x9de   : > { %p1694_p3 = por %p1693_p8, %p1692_p4 }
 0x9df   : > { %p1690_p10 = pneg %p1689_p5 }
 0x9e1   : > { %p1695_p11 = pnand %p1694_p3, %p1690_p10 }
 0x9e3   : > { %1698 = shalt.err (!%p1695_p11)
}
 0x9e4   : > { %1505 = dma.vmem_to_hbm [thread:$0]  (%p2065_p0), %s1274_s23, 128, %s2008_s18, %s1260_s20  }
 0x9e5 PF: > { %s1285_s9 = sand.u32 1, %s1729_s12   ;;  %p2066_p1 = scmp.ne.s32.totalorder %s2055_s19, 0 }
 0x9e6   : > { %p2067_p2 = scmp.ge.s32.totalorder %s1741_s15, 2  ;;  %s1286_s21 = scalar_lea.sflag [#allocation4], %s1285_s9 }
 0x9e8   : > { %p1519_p6 = pnand %p2067_p2, %p2066_p1 }
 0x9ea   : > { %p1520_p12 = pneg %p1519_p6 }
 0x9ec   : > { %1724 = dma.done.wait (%p1520_p12), %s1286_s21, 128  }
 0x9ed   : > { %1726 = vsyncadd (%p1520_p12), %s1286_s21, 4294967168  ;;  %p17_p7 = scmp.ge.s32.totalorder %s1854_s7, 4   ;;  %s2068_s12 = smov %s1733_s13 }
 0x9ee   : > { %s2069_s13 = smov %s1737_s14  ;;  %s2070_s14 = smov %s1870_s11 }
 0x9ef   : > { %s2071_s15 = smov %s1854_s7  ;;  %19 = sbr.rel (!%p17_p7) target bundleno = 6 (0x6), region = 85 }
 0x9f4   :  { %1291 = vsyncpa [#allocation3], 1 }
 0x9f5   :  { %1293 = vsyncpa [#allocation3 + $0x1], 1 }
 0x9f6   :  { %1294 = vsyncpa [#allocation6], 1 }
 0x9f7   :  { %1295 = vsyncpa [#allocation4], 1 }
 0x9f8   :  { %1297 = vsyncpa [#allocation4 + $0x1], 1 }

</bundles_post_ra>
